<compile_context>
chip_gen: v7x
topology: tpu7x:2x2x1
jax: 0.10.0
libtpu: 0.0.40
codegen_flags: <defaults>
</compile_context>

<pallas_src>
import math
import functools

import numpy as np
import jax
import jax.numpy as jnp
from jax.experimental import pallas as pl
from jax.experimental.pallas import tpu as pltpu

EPS = 1e-6          # module-level EPS used in sample_logistic
BN_EPS = 1e-5       # nn.BatchNorm1d default eps
LEAKY_SLOPE = 0.01  # nn.LeakyReLU default negative_slope

# ---- synthetic config (small shapes consistent with the module) -------------
NUM_STATE_VAR = 4
NUM_ACTION_VAR = 1
FC_DIM0 = 8                      # fc_dims[0]
NCD_FC_DIMS = (32, 32)           # params.ours_params.ncd_fc_dims
BATCH = 16
K_SAMPLES = 3                    # params.ours_params.local_mask_sampling_num
TAU = 1.0

# learn_upper=True, learn_action=True
LCM1 = NUM_STATE_VAR
LCM2 = NUM_STATE_VAR + NUM_ACTION_VAR - 1
INPUT_DIM = (NUM_STATE_VAR + NUM_ACTION_VAR) * FC_DIM0
OUTPUT_DIM = LCM1 * LCM2
FULL_D = NUM_STATE_VAR + NUM_ACTION_VAR          # number of variables
F_FLAT = LCM1 * FULL_D                           # flattened log_alpha width (20)
F_PAD = 128                                      # lane-dense padded width


# ---- static fold of adjust_dimension_default into the final Linear -----------
# log_alpha[b, r, c] = 100          if c == r
#                    = z[b, r, c-1] if c > r      (triu contribution)
#                    = z[b, r, c]   if c < r      (tril(-1) contribution)
# Encoded as la_flat = z @ G + 100*diag_onehot with G[src, r*FULL_D + c] = 1
# and G's diagonal columns all-zero -> fold into wf/bf exactly.
def _build_gather_and_diag():
    g = np.zeros((OUTPUT_DIM, F_PAD), np.float32)
    for r in range(LCM1):
        for c in range(FULL_D):
            if c == r:
                continue
            src = r * LCM2 + (c - 1 if c > r else c)
            g[src, r * FULL_D + c] = 1.0
    diag = np.zeros((1, F_PAD), np.float32)
    for r in range(NUM_STATE_VAR):
        diag[0, r * (FULL_D + 1)] = 100.0
    return g, diag


_GATHER_NP, _DIAG_NP = _build_gather_and_diag()


# ---- fused kernel: MLP + (folded) adjust_dimension + sigmoid + gumbel --------
def fused_kernel(x_ref, w1_ref, w2_ref, wfg_ref, bfg_ref, noise_ref,
                 sample_ref, prob_ref, *, tau, hard):

    def bn_leaky(h):
        # BatchNorm1d training mode: batch mean, biased batch var, gamma=1,
        # beta=0 (kaiming_init only touches nn.Linear). One-pass moments:
        # two independent sublane reductions instead of a serial chain.
        inv_n = 1.0 / h.shape[0]
        s1 = jnp.sum(h, axis=0, keepdims=True)
        s2 = jnp.sum(h * h, axis=0, keepdims=True)
        mean = s1 * inv_n
        var = s2 * inv_n - mean * mean
        h = (h - mean) * jax.lax.rsqrt(var + BN_EPS)
        return jnp.maximum(h, LEAKY_SLOPE * h)   # LeakyReLU

    # fc0 (preprocess already folded into a single lane-dense (bs, 40) operand)
    h = bn_leaky(jnp.dot(x_ref[...], w1_ref[...],
                         preferred_element_type=jnp.float32))
    # fc1
    h = bn_leaky(jnp.dot(h, w2_ref[...], preferred_element_type=jnp.float32))
    # fc_final with adjust_dimension folded in: la = h @ (wf@G) + (bf@G + diag)
    la = jnp.dot(h, wfg_ref[...], preferred_element_type=jnp.float32) + bfg_ref[...]

    prob_ref[...] = jax.nn.sigmoid(la)

    # gumbel-sigmoid sampling (logistic noise supplied by the wrapper)
    logits = la[None, :, :] + noise_ref[...]
    if hard:
        # sigmoid(x / tau) > 0.5  <=>  x > 0 for tau > 0: skip sigmoid + divide.
        # TODO(synk): straight-through estimator (y_hard - sg(y_soft) + y_soft)
        # needs jax.custom_vjp for gradients; forward value only here.
        sample_ref[...] = (logits > 0.0).astype(sample_ref.dtype)
    else:
        sample_ref[...] = jax.nn.sigmoid(logits * (1.0 / tau)).astype(sample_ref.dtype)


# ---- wrapper ------------------------------------------------------------------
def gumbel_matrix_ncd_forward(feature, action, params, rng_key, *,
                              tau=1.0, drawhard=True, training=True):
    w1, w2, wf, bf = params
    bs = feature.shape[1]

    # preprocess_ours_mask: cat -> permute -> flatten (pure layout, done once
    # in the wrapper so the kernel sees one lane-dense LHS and one W1 matmul).
    x = jnp.concatenate([feature, action], axis=0)          # (FULL_D, bs, FC_DIM0)
    x = jnp.transpose(x, (1, 0, 2)).reshape(bs, INPUT_DIM)   # (bs, 40)
    w1f = w1.reshape(INPUT_DIM, NCD_FC_DIMS[0])              # (40, 32)

    # Fold adjust_dimension into the final Linear (exact: G diag columns are 0).
    gmat = jnp.asarray(_GATHER_NP)
    wfg = wf @ gmat                                           # (32, 128)
    bfg = bf @ gmat + jnp.asarray(_DIAG_NP)                   # (1, 128)

    # Logistic noise generated outside the kernel (pltpu.prng_* is unavailable
    # under interpret/CPU lowering; this keeps the kernel backend-portable).
    # TODO(synk): torch.rand RNG stream cannot be reproduced bitwise.
    u = jax.random.uniform(rng_key, (K_SAMPLES, bs, F_PAD), jnp.float32)
    u = jnp.clip(u, EPS, 1.0 - EPS)
    noise = jnp.log(u) - jnp.log(1.0 - u)

    sample_dtype = jnp.bfloat16 if drawhard else jnp.float32  # {0,1} exact in bf16
    kernel = functools.partial(fused_kernel, tau=float(tau), hard=bool(drawhard))
    vmem = pl.BlockSpec(memory_space=pltpu.MemorySpace.VMEM)
    sample_pad, prob_pad = pl.pallas_call(
        kernel,
        out_shape=(
            jax.ShapeDtypeStruct((K_SAMPLES, bs, F_PAD), sample_dtype),
            jax.ShapeDtypeStruct((bs, F_PAD), jnp.float32),
        ),
        in_specs=[vmem] * 6,          # x, w1f, w2, wfg, bfg, noise
        out_specs=(vmem, vmem),
    )(x, w1f, w2, wfg, bfg, noise)

    prob = prob_pad[:, :F_FLAT].reshape(bs, NUM_STATE_VAR, FULL_D)
    if training:
        sample = sample_pad[:, :, :F_FLAT].astype(jnp.float32).reshape(
            K_SAMPLES, bs, NUM_STATE_VAR, FULL_D)
    else:
        # TODO(synk): eval-mode BatchNorm running stats are not tracked; prob
        # here still uses batch statistics.
        sample = (prob > 0.5).astype(jnp.float32)[None]
    return sample, prob


# ---- parameter init (deterministic, mirrors kaiming_init with a=sqrt(3)) -----
def init_params(key):
    keys = jax.random.split(key, 4)

    def kaiming_uniform(k, shape, fan_in):
        # gain = sqrt(2/(1+a^2)) with a=sqrt(3) -> bound = sqrt(1.5/fan_in)
        bound = math.sqrt(1.5 / fan_in)
        return jax.random.uniform(k, shape, jnp.float32, -bound, bound)

    # W1 stored per-variable: (FULL_D, FC_DIM0, H1) == transpose of nn.Linear
    # weight (H1, INPUT_DIM) reshaped by variable row-blocks.
    w1 = kaiming_uniform(keys[0], (FULL_D, FC_DIM0, NCD_FC_DIMS[0]), INPUT_DIM)
    w2 = kaiming_uniform(keys[1], (NCD_FC_DIMS[0], NCD_FC_DIMS[1]), NCD_FC_DIMS[0])
    wf = kaiming_uniform(keys[2], (NCD_FC_DIMS[1], OUTPUT_DIM), NCD_FC_DIMS[1])
    bb = 1.0 / math.sqrt(NCD_FC_DIMS[1])
    bf = jax.random.uniform(keys[3], (1, OUTPUT_DIM), jnp.float32, -bb, bb)
    return w1, w2, wf, bf


# ---- pure-JAX reference for the deterministic part (prob) --------------------
def _reference_prob(feature, action, params):
    w1, w2, wf, bf = params
    bs = feature.shape[1]
    x = jnp.concatenate([feature, action], axis=0)
    x = jnp.transpose(x, (1, 0, 2)).reshape(bs, -1)
    w1f = w1.reshape(INPUT_DIM, NCD_FC_DIMS[0])

    def bn_leaky(h):
        m = h.mean(0, keepdims=True)
        v = ((h - m) ** 2).mean(0, keepdims=True)
        h = (h - m) / jnp.sqrt(v + BN_EPS)
        return jnp.where(h >= 0, h, LEAKY_SLOPE * h)

    h = bn_leaky(x @ w1f)
    h = bn_leaky(h @ w2)
    z = h @ wf + bf
    zr = z.reshape(bs, LCM1, LCM2)
    row = jnp.arange(LCM1)[:, None]
    col = jnp.arange(LCM2)[None, :]
    triu = jnp.where(col >= row, zr, 0.0)
    tril = jnp.where(col <= row - 1, zr, 0.0)
    la = jnp.zeros((bs, NUM_STATE_VAR, FULL_D), jnp.float32)
    la = la.at[:, :, 1:1 + LCM2].add(triu)
    la = la.at[:, :, :LCM2].add(tril)
    d = jnp.arange(NUM_STATE_VAR)
    la = la.at[:, d, d].set(100.0)
    return jax.nn.sigmoid(la)


if __name__ == "__main__":
    key = jax.random.PRNGKey(0)
    pkey, fkey, akey, nkey = jax.random.split(key, 4)
    params = init_params(pkey)
    feature = jax.random.normal(fkey, (NUM_STATE_VAR, BATCH, FC_DIM0), jnp.float32)
    action = jax.random.normal(akey, (NUM_ACTION_VAR, BATCH, FC_DIM0), jnp.float32)

    fwd = jax.jit(functools.partial(gumbel_matrix_ncd_forward,
                                    tau=TAU, drawhard=True, training=True))
    sample, prob = fwd(feature, action, params, nkey)
    jax.block_until_ready((sample, prob))

    assert sample.shape == (K_SAMPLES, BATCH, NUM_STATE_VAR, FULL_D)
    assert prob.shape == (BATCH, NUM_STATE_VAR, FULL_D)
    # hard samples are exactly {0,1}
    assert bool(jnp.all((sample == 0.0) | (sample == 1.0)))
    # diagonal log_alpha forced to 100 -> prob ~ 1 there
    diag = jnp.arange(NUM_STATE_VAR)
    assert float(jnp.min(prob[:, diag, diag])) > 0.999
    # deterministic path matches a pure-JAX reference of the PyTorch module
    prob_ref = _reference_prob(feature, action, params)
    assert bool(jnp.allclose(prob, prob_ref, atol=1e-4, rtol=1e-4))
    print("KERNEL_OK")
</pallas_src>

<mosaic_0001>
module attributes {stable_mosaic.version = 11 : i64} {
  func.func @fused_kernel(%arg0: memref<16x40xf32, #tpu.memory_space<vmem>>, %arg1: memref<40x32xf32, #tpu.memory_space<vmem>>, %arg2: memref<32x32xf32, #tpu.memory_space<vmem>>, %arg3: memref<32x128xf32, #tpu.memory_space<vmem>>, %arg4: memref<1x128xf32, #tpu.memory_space<vmem>>, %arg5: memref<3x16x128xf32, #tpu.memory_space<vmem>>, %arg6: memref<3x16x128xbf16, #tpu.memory_space<vmem>>, %arg7: memref<16x128xf32, #tpu.memory_space<vmem>>) attributes {dimension_semantics = [], scalar_prefetch = 0 : i64, scratch_operands = 0 : i64, tpu.core_type = #tpu.core_type<tc>} {
    %c0 = arith.constant 0 : index
    %c0_0 = arith.constant 0 : index
    %0 = vector.load %arg0[%c0, %c0_0] : memref<16x40xf32, #tpu.memory_space<vmem>>, vector<16x40xf32>
    %c0_1 = arith.constant 0 : index
    %c0_2 = arith.constant 0 : index
    %1 = vector.load %arg1[%c0_1, %c0_2] : memref<40x32xf32, #tpu.memory_space<vmem>>, vector<40x32xf32>
    %cst = arith.constant dense<0.000000e+00> : vector<16x32xf32>
    %2 = tpu.matmul %0, %1, %cst {dimension_numbers = #tpu.dot_dimension_numbers<[1], [0], [0], [1], [0, 0, 1, 1], [], []>} : vector<16x40xf32>, vector<40x32xf32>, vector<16x32xf32> -> vector<16x32xf32>
    %cst_3 = arith.constant dense<0.000000e+00> : vector<32xf32>
    %3 = vector.multi_reduction <add>, %2, %cst_3 [0] : vector<16x32xf32> to vector<32xf32>
    %4 = vector.shape_cast %3 : vector<32xf32> to vector<1x32xf32>
    %5 = arith.mulf %2, %2 : vector<16x32xf32>
    %cst_4 = arith.constant dense<0.000000e+00> : vector<32xf32>
    %6 = vector.multi_reduction <add>, %5, %cst_4 [0] : vector<16x32xf32> to vector<32xf32>
    %7 = vector.shape_cast %6 : vector<32xf32> to vector<1x32xf32>
    %cst_5 = arith.constant 6.250000e-02 : f32
    %8 = vector.broadcast %cst_5 : f32 to vector<1x32xf32>
    %9 = arith.mulf %4, %8 : vector<1x32xf32>
    %cst_6 = arith.constant 6.250000e-02 : f32
    %10 = vector.broadcast %cst_6 : f32 to vector<1x32xf32>
    %11 = arith.mulf %7, %10 : vector<1x32xf32>
    %12 = arith.mulf %9, %9 : vector<1x32xf32>
    %13 = arith.subf %11, %12 : vector<1x32xf32>
    %14 = vector.broadcast %9 : vector<1x32xf32> to vector<16x32xf32>
    %15 = arith.subf %2, %14 : vector<16x32xf32>
    %cst_7 = arith.constant 9.99999974E-6 : f32
    %16 = vector.broadcast %cst_7 : f32 to vector<1x32xf32>
    %17 = arith.addf %13, %16 : vector<1x32xf32>
    %18 = math.rsqrt %17 : vector<1x32xf32>
    %19 = vector.broadcast %18 : vector<1x32xf32> to vector<16x32xf32>
    %20 = arith.mulf %15, %19 : vector<16x32xf32>
    %cst_8 = arith.constant 0.00999999977 : f32
    %21 = vector.broadcast %cst_8 : f32 to vector<16x32xf32>
    %22 = arith.mulf %21, %20 : vector<16x32xf32>
    %23 = arith.maximumf %20, %22 : vector<16x32xf32>
    %c0_9 = arith.constant 0 : index
    %c0_10 = arith.constant 0 : index
    %24 = vector.load %arg2[%c0_9, %c0_10] : memref<32x32xf32, #tpu.memory_space<vmem>>, vector<32x32xf32>
    %cst_11 = arith.constant dense<0.000000e+00> : vector<16x32xf32>
    %25 = tpu.matmul %23, %24, %cst_11 {dimension_numbers = #tpu.dot_dimension_numbers<[1], [0], [0], [1], [0, 0, 1, 1], [], []>} : vector<16x32xf32>, vector<32x32xf32>, vector<16x32xf32> -> vector<16x32xf32>
    %cst_12 = arith.constant dense<0.000000e+00> : vector<32xf32>
    %26 = vector.multi_reduction <add>, %25, %cst_12 [0] : vector<16x32xf32> to vector<32xf32>
    %27 = vector.shape_cast %26 : vector<32xf32> to vector<1x32xf32>
    %28 = arith.mulf %25, %25 : vector<16x32xf32>
    %cst_13 = arith.constant dense<0.000000e+00> : vector<32xf32>
    %29 = vector.multi_reduction <add>, %28, %cst_13 [0] : vector<16x32xf32> to vector<32xf32>
    %30 = vector.shape_cast %29 : vector<32xf32> to vector<1x32xf32>
    %cst_14 = arith.constant 6.250000e-02 : f32
    %31 = vector.broadcast %cst_14 : f32 to vector<1x32xf32>
    %32 = arith.mulf %27, %31 : vector<1x32xf32>
    %cst_15 = arith.constant 6.250000e-02 : f32
    %33 = vector.broadcast %cst_15 : f32 to vector<1x32xf32>
    %34 = arith.mulf %30, %33 : vector<1x32xf32>
    %35 = arith.mulf %32, %32 : vector<1x32xf32>
    %36 = arith.subf %34, %35 : vector<1x32xf32>
    %37 = vector.broadcast %32 : vector<1x32xf32> to vector<16x32xf32>
    %38 = arith.subf %25, %37 : vector<16x32xf32>
    %cst_16 = arith.constant 9.99999974E-6 : f32
    %39 = vector.broadcast %cst_16 : f32 to vector<1x32xf32>
    %40 = arith.addf %36, %39 : vector<1x32xf32>
    %41 = math.rsqrt %40 : vector<1x32xf32>
    %42 = vector.broadcast %41 : vector<1x32xf32> to vector<16x32xf32>
    %43 = arith.mulf %38, %42 : vector<16x32xf32>
    %cst_17 = arith.constant 0.00999999977 : f32
    %44 = vector.broadcast %cst_17 : f32 to vector<16x32xf32>
    %45 = arith.mulf %44, %43 : vector<16x32xf32>
    %46 = arith.maximumf %43, %45 : vector<16x32xf32>
    %c0_18 = arith.constant 0 : index
    %c0_19 = arith.constant 0 : index
    %47 = vector.load %arg3[%c0_18, %c0_19] : memref<32x128xf32, #tpu.memory_space<vmem>>, vector<32x128xf32>
    %cst_20 = arith.constant dense<0.000000e+00> : vector<16x128xf32>
    %48 = tpu.matmul %46, %47, %cst_20 {dimension_numbers = #tpu.dot_dimension_numbers<[1], [0], [0], [1], [0, 0, 1, 1], [], []>} : vector<16x32xf32>, vector<32x128xf32>, vector<16x128xf32> -> vector<16x128xf32>
    %c0_21 = arith.constant 0 : index
    %c0_22 = arith.constant 0 : index
    %49 = vector.load %arg4[%c0_21, %c0_22] : memref<1x128xf32, #tpu.memory_space<vmem>>, vector<1x128xf32>
    %50 = vector.broadcast %49 : vector<1x128xf32> to vector<16x128xf32>
    %51 = arith.addf %48, %50 : vector<16x128xf32>
    %52 = arith.negf %51 : vector<16x128xf32>
    %53 = math.exp %52 : vector<16x128xf32>
    %cst_23 = arith.constant 1.000000e+00 : f32
    %54 = vector.broadcast %cst_23 : f32 to vector<16x128xf32>
    %55 = arith.addf %54, %53 : vector<16x128xf32>
    %56 = arith.divf %54, %55 : vector<16x128xf32>
    %c0_24 = arith.constant 0 : index
    %c0_25 = arith.constant 0 : index
    %57 = vector.load %arg7[%c0_24, %c0_25] : memref<16x128xf32, #tpu.memory_space<vmem>>, vector<16x128xf32>
    tpu.vector_store %arg7[%c0_24, %c0_25], %56 {strides = array<i32>} : memref<16x128xf32, #tpu.memory_space<vmem>>, vector<16x128xf32>,
    %58 = vector.shape_cast %51 : vector<16x128xf32> to vector<1x16x128xf32>
    %c0_26 = arith.constant 0 : index
    %c0_27 = arith.constant 0 : index
    %c0_28 = arith.constant 0 : index
    %59 = vector.load %arg5[%c0_26, %c0_27, %c0_28] : memref<3x16x128xf32, #tpu.memory_space<vmem>>, vector<3x16x128xf32>
    %60 = vector.broadcast %58 : vector<1x16x128xf32> to vector<3x16x128xf32>
    %61 = arith.addf %60, %59 : vector<3x16x128xf32>
    %cst_29 = arith.constant 0.000000e+00 : f32
    %62 = vector.broadcast %cst_29 : f32 to vector<3x16x128xf32>
    %63 = arith.cmpf ogt, %61, %62 : vector<3x16x128xf32>
    %64 = arith.extui %63 : vector<3x16x128xi1> to vector<3x16x128xi32>
    %65 = arith.sitofp %64 : vector<3x16x128xi32> to vector<3x16x128xf32>
    %66 = arith.truncf %65 : vector<3x16x128xf32> to vector<3x16x128xbf16>
    %c0_30 = arith.constant 0 : index
    %c0_31 = arith.constant 0 : index
    %c0_32 = arith.constant 0 : index
    %67 = vector.load %arg6[%c0_30, %c0_31, %c0_32] : memref<3x16x128xbf16, #tpu.memory_space<vmem>>, vector<3x16x128xbf16>
    tpu.vector_store %arg6[%c0_30, %c0_31, %c0_32], %66 {strides = array<i32>} : memref<3x16x128xbf16, #tpu.memory_space<vmem>>, vector<3x16x128xbf16>,
    return
  }
}

</mosaic_0001>

<bundles_post_ra>
// kernel: gumbel_matrix_ncd_forward.1
= control target key start
LH: loop header
LB: loop body
LE: loop exit
PB: predicated region body
PF: predicated region fallthrough
CT: control target
= control target key end

     0   :  { %vm32_vm0 = vcmask 326656   ;;  %vm114_vm1 = vcmask 261120   ;;  %s707_s1 = inlined_call_operand.vmem [shape: f32[40,32], index: 1, kind: input, shape index: {}]   ;;  %s708_s0 = inlined_call_operand.vmem [shape: f32[16,40], index: 0, kind: input, shape index: {}]   ;;  %s709_s2 = inlined_call_operand.vmem [shape: f32[32,32], index: 2, kind: input, shape index: {}]   ;;  %s710_s3 = inlined_call_operand.vmem [shape: f32[32,128], index: 3, kind: input, shape index: {}]   ;;  %s711_s4 = inlined_call_operand.vmem [shape: f32[1,128], index: 4, kind: input, shape index: {}]   ;;  %s712_s5 = inlined_call_operand.vmem [shape: f32[3,16,128], index: 5, kind: input, shape index: {}]   ;;  %s713_s6 = inlined_call_operand.vmem [shape: bf16[3,16,128], index: 6, kind: output, shape index: {0}]   ;;  %s714_s7 = inlined_call_operand.vmem [shape: f32[16,128], index: 7, kind: output, shape index: {1}]  }
   0x1   :  { %v27_v0 = vld [vmem:[%s707_s1] sm:$0xff]  ;;  %v28_v1 = vld [vmem:[%s707_s1 + $0x8] sm:$0xff]  ;;  %v29_v2 = vld [vmem:[%s707_s1 + $0x10] sm:$0xff] }
   0x2   :  { %v534_v3 = vpack.c.bf16 %v28_v1, %v27_v0  ;;  %v30_v4 = vld [vmem:[%s707_s1 + $0x18] sm:$0xff]  ;;  %v25_v5 = vld [vmem:[%s708_s0] sm:$0xff]  ;;  %v26_v8 = vld [vmem:[%s708_s0 + $0x8] sm:$0xff] }
   0x3   :  { %v538_v6 = vpack.c.bf16 %v30_v4, %v29_v2  ;;  %509 = vmatprep.mubr.msk.f32.mxu0 %vm32_vm0, %v25_v5  ;;  %v31_v7 = vld [vmem:[%s707_s1 + $0x20] sm:$0xff]  ;;  %v150_v10 = vld [vmem:[%s709_s2 + $0x8] sm:$0xff]  ;;  %v151_v11 = vld [vmem:[%s709_s2 + $0x10] sm:$0xff] }
   0x4   :  { %535 = vmatprep.subr.bf16.mxu0 %v534_v3  ;;  %v149_v9 = vld [vmem:[%s709_s2] sm:$0xff]  ;;  %v152_v13 = vld [vmem:[%s709_s2 + $0x18] sm:$0xff]  ;;  %v269_v52 = vld [vmem:[%s710_s3 + $0x8] sm:$0xff] }
   0x5   :  { %537 = vmatpush3.bf16.msra.mxu0 %v534_v3  ;;  %v542_v12 = vpack.c.bf16 %v150_v10, %v149_v9  ;;  %v546_v14 = vpack.c.bf16 %v152_v13, %v151_v11  ;;  %v268_v51 = vld [vmem:[%s710_s3] sm:$0xff]  ;;  %v270_v54 = vld [vmem:[%s710_s3 + $0x10] sm:$0xff]  ;;  %v271_v55 = vld [vmem:[%s710_s3 + $0x18] sm:$0xff] }
   0x6   :  { %539 = vmatprep.subr.bf16.mxu0 %v538_v6  ;;  %v550_v53 = vpack.c.bf16 %v269_v52, %v268_v51  ;;  %v554_v56 = vpack.c.bf16 %v271_v55, %v270_v54 }
   0x7   :  { %543 = vmatprep.subr.bf16.mxu1 %v542_v12 }
   0x8   :  { %545 = vmatpush3.bf16.msra.mxu1 %v542_v12 }
   0x9   :  { %541 = vmatpush3.bf16.msra.mxu0 %v538_v6  ;;  %547 = vmatprep.subr.bf16.mxu1 %v546_v14 }
   0xa   :  { %507 = vmatprep.subr.mxu0 %v31_v7 }
   0xc   :  { %549 = vmatpush3.bf16.msra.mxu1 %v546_v14 }
   0xd   :  { %508 = vmatpush3.msra.mxu0 %v31_v7  ;;  %551 = vmatprep.subr.bf16.mxu1 %v550_v53 }
   0xe   :  { %510 = vmatmul.mubr.msk.f32.vlgmr.msra.gmra.mrb[0].mxu0 %vm32_vm0, %v26_v8 }
  0xe1   :  { %v511_v15 = vpop.f32.mrb[0].mxu0 }
  0xe2   :  { %v116_v16 = vsel %vm114_vm1, %v511_v15, 0.0  ;;  %v125_v17 = vmul.f32 %v511_v15, %v511_v15  ;;  %v105_v18 = vpop.f32.mrb[1].mxu0 }
  0xe3   :  { %v115_v19 = vsel %vm114_vm1, %v105_v18, 0.0  ;;  %v124_v20 = vmul.f32 %v105_v18, %v105_v18 }
  0xe4   :  { %v127_v21 = vsel %vm114_vm1, %v125_v17, 0.0  ;;  %v117_v22 = vadd.f32 %v116_v16, %v115_v19 }
  0xe5   :  { %v126_v23 = vsel %vm114_vm1, %v124_v20, 0.0 }
  0xe6   :  { %v118_v24 = vrot.slane %v117_v22, 4  ;;  %v128_v25 = vadd.f32 %v127_v21, %v126_v23 }
  0xe8   :  { %v119_v26 = vadd.f32 %v118_v24, %v117_v22  ;;  %v129_v27 = vrot.slane %v128_v25, 4 }
  0xea   :  { %v120_v28 = vrot.slane %v119_v26, 2  ;;  %v130_v29 = vadd.f32 %v129_v27, %v128_v25 }
  0xec   :  { %v121_v30 = vadd.f32 %v120_v28, %v119_v26  ;;  %v131_v31 = vrot.slane %v130_v29, 2 }
  0xee   :  { %v122_v32 = vrot.slane %v121_v30, 1  ;;  %v132_v33 = vadd.f32 %v131_v31, %v130_v29  ;;  %v446_v29 = vld [vmem:[%s711_s4] ss:$0 sm:$0xff]  ;;  %v375_v31 = vld [vmem:[%s712_s5 + $0x8] sm:$0xff] }
  0xf0   :  { %v123_v34 = vadd.f32 %v122_v32, %v121_v30  ;;  %v133_v35 = vrot.slane %v132_v33, 1  ;;  %v377_v32 = vld [vmem:[%s712_s5 + $0x18] sm:$0xff] }
  0xf2   :  { %v134_v36 = vadd.f32 %v133_v35, %v132_v33  ;;  %v135_v37 = vmul.f32 0.0625, %v123_v34  ;;  %v379_v33 = vld [vmem:[%s712_s5 + $0x28] sm:$0xff] }
  0xf4   :  { %v136_v38 = vmul.f32 0.0625, %v134_v36  ;;  %v137_v39 = vmul.f32 %v135_v37, %v135_v37  ;;  %v139_v40 = vsub.f32 %v105_v18, %v135_v37  ;;  %v140_v41 = vsub.f32 %v511_v15, %v135_v37  ;;  %v374_v36 = vld [vmem:[%s712_s5] sm:$0xff]  ;;  %v376_v37 = vld [vmem:[%s712_s5 + $0x10] sm:$0xff] }
  0xf6   :  { %v138_v42 = vsub.f32 %v136_v38, %v137_v39  ;;  %v378_v38 = vld [vmem:[%s712_s5 + $0x20] sm:$0xff] }
  0xf8   :  { %v141_v43 = vadd.f32 1e-05, %v138_v42 }
  0xfa   :  { %559 = vrsqrt.f32 %v141_v43 }
 0x104   :  { %v560_v44 = vpop.eup %559 }
 0x105   :  { %v143_v45 = vmul.f32 %v560_v44, %v139_v40  ;;  %v144_v46 = vmul.f32 %v560_v44, %v140_v41 }
 0x107   :  { %v145_v47 = vmul.f32 0.01, %v143_v45  ;;  %v146_v48 = vmul.f32 0.01, %v144_v46 }
 0x109   :  { %v147_v49 = vmax.f32 %v143_v45, %v145_v47  ;;  %v148_v50 = vmax.f32 %v144_v46, %v146_v48  ;;  %v571_v48 = vmov 0.0  }
 0x10b   :  { %520 = vmatprep.mubr.msk.f32.mxu1 %vm114_vm1, %v147_v49 }
 0x10c   :  { %521 = vmatmul.mubr.msk.f32.vlgmr.msra.gmra.mrb[0].mxu1 %vm114_vm1, %v148_v50 }
 0x10d   :  { %553 = vmatpush3.bf16.msra.mxu1 %v550_v53 }
 0x10e   :  { %555 = vmatprep.subr.bf16.mxu1 %v554_v56 }
 0x111   :  { %557 = vmatpush3.bf16.msra.mxu1 %v554_v56 }
 0x1df   :  { %v522_v57 = vpop.f32.mrb[0].mxu1 }
 0x1e0   :  { %v235_v58 = vsel %vm114_vm1, %v522_v57, 0.0  ;;  %v244_v59 = vmul.f32 %v522_v57, %v522_v57  ;;  %v225_v60 = vpop.f32.mrb[1].mxu1 }
 0x1e1   :  { %v234_v61 = vsel %vm114_vm1, %v225_v60, 0.0  ;;  %v243_v62 = vmul.f32 %v225_v60, %v225_v60 }
 0x1e2   :  { %v246_v63 = vsel %vm114_vm1, %v244_v59, 0.0  ;;  %v236_v0 = vadd.f32 %v235_v58, %v234_v61 }
 0x1e3   :  { %v245_v1 = vsel %vm114_vm1, %v243_v62, 0.0 }
 0x1e4   :  { %v237_v2 = vrot.slane %v236_v0, 4  ;;  %v247_v3 = vadd.f32 %v246_v63, %v245_v1 }
 0x1e6   :  { %v238_v4 = vadd.f32 %v237_v2, %v236_v0  ;;  %v248_v5 = vrot.slane %v247_v3, 4 }
 0x1e8   :  { %v239_v6 = vrot.slane %v238_v4, 2  ;;  %v249_v7 = vadd.f32 %v248_v5, %v247_v3 }
 0x1ea   :  { %v240_v8 = vadd.f32 %v239_v6, %v238_v4  ;;  %v250_v9 = vrot.slane %v249_v7, 2 }
 0x1ec   :  { %v241_v10 = vrot.slane %v240_v8, 1  ;;  %v251_v11 = vadd.f32 %v250_v9, %v249_v7 }
 0x1ee   :  { %v242_v12 = vadd.f32 %v241_v10, %v240_v8  ;;  %v252_v13 = vrot.slane %v251_v11, 1 }
 0x1f0   :  { %v253_v14 = vadd.f32 %v252_v13, %v251_v11  ;;  %v254_v15 = vmul.f32 0.0625, %v242_v12 }
 0x1f2   :  { %v255_v16 = vmul.f32 0.0625, %v253_v14  ;;  %v256_v17 = vmul.f32 %v254_v15, %v254_v15  ;;  %v258_v18 = vsub.f32 %v225_v60, %v254_v15  ;;  %v259_v19 = vsub.f32 %v522_v57, %v254_v15 }
 0x1f4   :  { %v257_v20 = vsub.f32 %v255_v16, %v256_v17 }
 0x1f6   :  { %v260_v21 = vadd.f32 1e-05, %v257_v20 }
 0x1f8   :  { %561 = vrsqrt.f32 %v260_v21 }
 0x202   :  { %v562_v22 = vpop.eup %561 }
 0x203   :  { %v262_v23 = vmul.f32 %v562_v22, %v258_v18  ;;  %v263_v24 = vmul.f32 %v562_v22, %v259_v19 }
 0x205   :  { %v264_v25 = vmul.f32 0.01, %v262_v23  ;;  %v265_v26 = vmul.f32 0.01, %v263_v24 }
 0x207   :  { %v266_v27 = vmax.f32 %v262_v23, %v264_v25  ;;  %v267_v28 = vmax.f32 %v263_v24, %v265_v26 }
 0x209   :  { %531 = vmatprep.mubr.msk.f32.mxu1 %vm114_vm1, %v266_v27 }
 0x20a   :  { %532 = vmatmul.mubr.msk.f32.vlgmr.msra.gmra.mrb[2].mxu1 %vm114_vm1, %v267_v28 }
 0x2dd   :  { %v533_v30 = vpop.f32.mrb[2].mxu1 }
 0x2de   :  { %v357_v34 = vadd.f32 %v533_v30, %v446_v29  ;;  %v351_v35 = vpop.f32.mrb[3].mxu1 }
 0x2df   :  { %v352_v39 = vadd.f32 %v446_v29, %v351_v35 }
 0x2e0   :  { %v450_v40 = vmul.f32 -1.442695, %v357_v34  ;;  %v381_v41 = vadd.f32 %v375_v31, %v357_v34  ;;  %v383_v42 = vadd.f32 %v377_v32, %v357_v34  ;;  %v385_v43 = vadd.f32 %v379_v33, %v357_v34 }
 0x2e1   :  { %v449_v44 = vmul.f32 -1.442695, %v352_v39  ;;  %v380_v45 = vadd.f32 %v374_v36, %v352_v39  ;;  %v382_v46 = vadd.f32 %v376_v37, %v352_v39  ;;  %v384_v47 = vadd.f32 %v378_v38, %v352_v39 }
 0x2e2   :  { %563 = vpow2.f32 %v450_v40  ;;  %vm387_vm2 = vcmp.gt.f32.partialorder %v381_v41, 0.0  ;;  %vm389_vm3 = vcmp.gt.f32.partialorder %v383_v42, 0.0  ;;  %vm391_vm4 = vcmp.gt.f32.partialorder %v385_v43, 0.0 }
 0x2e3   :  { %v452_v49 = vsel %vm387_vm2, 1.0, %v571_v48  ;;  %v454_v50 = vsel %vm389_vm3, 1.0, %v571_v48  ;;  %v456_v51 = vsel %vm391_vm4, 1.0, %v571_v48  ;;  %565 = vpow2.f32 %v449_v44 }
 0x2e4   :  { %vm386_vm5 = vcmp.gt.f32.partialorder %v380_v45, 0.0  ;;  %vm388_vm6 = vcmp.gt.f32.partialorder %v382_v46, 0.0  ;;  %vm390_vm7 = vcmp.gt.f32.partialorder %v384_v47, 0.0 }
 0x2e5   :  { %v451_v52 = vsel %vm386_vm5, 1.0, %v571_v48  ;;  %v453_v53 = vsel %vm388_vm6, 1.0, %v571_v48  ;;  %v455_v54 = vsel %vm390_vm7, 1.0, %v571_v48 }
 0x2e6   :  { %v470_v55 = vpack.c.bf16 %v452_v49, %v451_v52  ;;  %v473_v56 = vpack.c.bf16 %v454_v50, %v453_v53  ;;  %v476_v57 = vpack.c.bf16 %v456_v51, %v455_v54 }
 0x2e8   :  { %471 = vst [vmem:[%s713_s6] sm:$0xff] %v470_v55   ;;  %478 = vst [vmem:[%s713_s6 + $0x8] sm:$0xff] %v473_v56  }
 0x2e9   :  { %479 = vst [vmem:[%s713_s6 + $0x10] sm:$0xff] %v476_v57  }
 0x2ec   :  { %v564_v58 = vpop.eup %563 }
 0x2ed   :  { %v566_v59 = vpop.eup %565  ;;  %v367_v60 = vadd.f32 1.0, %v564_v58 }
 0x2ee   :  { %v366_v61 = vadd.f32 1.0, %v566_v59 }
 0x2ef   :  { %567 = vrcp.f32 %v367_v60 }
 0x2f0   :  { %569 = vrcp.f32 %v366_v61 }
 0x2f9   :  { %v568_v62 = vpop.eup %567 }
 0x2fa   :  { %v570_v63 = vpop.eup %569  ;;  %373 = vst [vmem:[%s714_s7 + $0x8] sm:$0xff] %v568_v62 }
 0x2fb   :  { %372 = vst [vmem:[%s714_s7] sm:$0xff] %v570_v63 }

</bundles_post_ra>
